<compile_context>
chip_gen: v5e
topology: v5e:2x2
jax: 0.10.0
libtpu: 0.0.40
codegen_flags: <defaults>
</compile_context>

<pallas_src>
import functools

import jax
import jax.numpy as jnp
from jax.experimental import pallas as pl
from jax.experimental.pallas import tpu as pltpu

LN_EPS = 1e-5  # PyTorch nn.LayerNorm default


def _round_up(x, m):
    return ((x + m - 1) // m) * m


def _prenorm_linear_kernel(x_ref, g_ref, b_ref, w_ref, wb_ref, o_ref, y_ref):
    # x_ref:  (TR, D)  row tile (input dtype)
    # g_ref:  (1, D)   LayerNorm gamma, f32
    # b_ref:  (1, D)   LayerNorm beta, f32
    # w_ref:  (D, TC)  Linear weight slab, (in, out) layout, bf16
    # wb_ref: (1, TC)  Linear bias slab, f32
    # o_ref:  (TR, TC) output tile (x dtype)
    # y_ref:  (TR, D)  bf16 VMEM scratch: LayerNorm(x) for the current row tile

    @pl.when(pl.program_id(1) == 0)
    def _compute_layernorm():
        x = x_ref[...].astype(jnp.float32)
        # Single read of the tile: mean and E[x^2]; biased variance (PyTorch).
        mean = jnp.mean(x, axis=-1, keepdims=True)
        var = jnp.mean(x * x, axis=-1, keepdims=True) - mean * mean
        inv = jax.lax.rsqrt(var + LN_EPS)
        scale = g_ref[...] * inv                       # fold gamma into 1/sigma
        y = (x - mean) * scale + b_ref[...]
        y_ref[...] = y.astype(jnp.bfloat16)

    # fn = Linear(D, D): bf16 operands, f32 accumulation on the MXU.
    out = jnp.dot(y_ref[...], w_ref[...], preferred_element_type=jnp.float32)
    o_ref[...] = (out + wb_ref[...]).astype(o_ref.dtype)


def _choose_tiling(rows, D, x_bytes, out_bytes, tile_rows, tile_cols):
    """Static (trace-time) tiling choices, generation-aware via VMEM capacity."""
    try:
        vmem_cap = int(getattr(pltpu.get_tpu_info(), "vmem_capacity_bytes",
                               64 << 20))
    except Exception:           # conservative fallback (v7x-sized)
        vmem_cap = 64 << 20
    budget = int(vmem_cap * 0.70)          # headroom for compiler scratch

    # ---- column slab: keep the full (D, D) bf16 weight resident when it fits
    # (single-buffered thanks to pl.Buffered(1)); otherwise pick the largest
    # multiple-of-128 divisor of D whose double-buffered slab fits.
    if tile_cols is None:
        if D * D * 2 <= int(0.45 * budget):
            tile_cols = D
        else:
            tile_cols = 0
            cand = (D // 128) * 128
            while cand >= 128:
                if D % cand == 0 and 2 * D * cand * 2 <= int(0.45 * budget):
                    tile_cols = cand
                    break
                cand -= 128
            if tile_cols == 0:
                # TODO(synk): D too large with no 128-aligned divisor; fall back
                # to a resident full-D weight and let vmem_limit_bytes stretch.
                tile_cols = D
    tc = tile_cols
    assert D % tc == 0, "tile_cols must divide D"
    assert tc == D or tc % 128 == 0, "tile_cols must be lane-aligned (x128) or D"

    # ---- row tile: big on 128 MiB parts (v5e/v6e), smaller on v7x (64 MiB).
    if tile_rows is None:
        tile_rows = 512 if vmem_cap >= (96 << 20) else 256

    def footprint(tr):
        f = 2 * tr * D * x_bytes                    # x tiles (double-buffered)
        f += 2 * tr * tc * out_bytes                # out tiles (double-buffered)
        f += (1 if tc == D else 2) * D * tc * 2     # bf16 weight slab
        f += tr * D * 2                             # bf16 LN scratch
        f += 4 * tr * D * 4                         # f32 LN intermediates
        f += 3 * _round_up(D, 128) * 4              # gamma / beta / linear bias
        return f

    tr = max(8, _round_up(min(tile_rows, _round_up(rows, 8)), 8))
    while tr > 64 and footprint(tr) > budget:
        tr //= 2
    # Keep >= 2 row-grid steps so the "parallel" row axis can feed both
    # TensorCores on v7x (free ~2x for small batches; harmless elsewhere).
    if rows > 8:
        tr = min(tr, _round_up(-(-rows // 2), 8))
    tr = max(8, _round_up(tr, 8))

    vmem_bytes = min(footprint(tr) + (4 << 20), vmem_cap)
    return tr, tc, int(vmem_bytes)


@functools.partial(jax.jit, static_argnames=("tile_rows", "tile_cols"))
def prenorm_linear(x, ln_gamma, ln_beta, w_t, w_bias, *, tile_rows=None,
                   tile_cols=None):
    """fn(LayerNorm(x)) with fn = Linear(D, D).

    x:   (B, N, D) activations (f32 or bf16; output dtype follows x).
    w_t: (D, D) Linear weight in (in, out) layout; store it bf16 outside the
         jit to avoid a per-call cast pass.
    """
    B, N, D = x.shape
    rows = B * N

    tr, tc, vmem_bytes = _choose_tiling(
        rows, D, x.dtype.itemsize, x.dtype.itemsize, tile_rows, tile_cols)

    x2 = x.reshape(rows, D)
    g2 = ln_gamma.reshape(1, D).astype(jnp.float32)
    b2 = ln_beta.reshape(1, D).astype(jnp.float32)
    w_bf = w_t if w_t.dtype == jnp.bfloat16 else w_t.astype(jnp.bfloat16)
    wb2 = w_bias.reshape(1, D).astype(jnp.float32)

    single = pl.Buffered(buffer_count=1)   # constant-index blocks: one buffer
    w_mode = single if tc == D else None   # slabbed W changes index -> default

    grid = (pl.cdiv(rows, tr), D // tc)    # partial last row block is masked

    out2 = pl.pallas_call(
        _prenorm_linear_kernel,
        out_shape=jax.ShapeDtypeStruct((rows, D), x.dtype),
        grid_spec=pltpu.PrefetchScalarGridSpec(
            num_scalar_prefetch=0,
            grid=grid,
            in_specs=[
                pl.BlockSpec((tr, D), lambda i, j: (i, 0)),    # x row tile
                pl.BlockSpec((1, D), lambda i, j: (0, 0),
                             pipeline_mode=single),            # gamma
                pl.BlockSpec((1, D), lambda i, j: (0, 0),
                             pipeline_mode=single),            # beta
                pl.BlockSpec((D, tc), lambda i, j: (0, j),
                             pipeline_mode=w_mode),            # W^T column slab
                pl.BlockSpec((1, tc), lambda i, j: (0, j),
                             pipeline_mode=w_mode),            # linear bias slab
            ],
            out_specs=pl.BlockSpec((tr, tc), lambda i, j: (i, j)),
            scratch_shapes=[pltpu.VMEM((tr, D), jnp.bfloat16)],  # cached LN(x)
        ),
        compiler_params=pltpu.CompilerParams(
            # Row axis parallel (megacore); column axis arbitrary because the
            # LN scratch carries state across column slabs.
            dimension_semantics=("parallel", "arbitrary"),
            vmem_limit_bytes=vmem_bytes,
        ),
    )(x2, g2, b2, w_bf, wb2)

    return out2.reshape(B, N, D)


def _reference(x, ln_gamma, ln_beta, w_t, w_bias):
    xf = x.astype(jnp.float32)
    mean = jnp.mean(xf, axis=-1, keepdims=True)
    var = jnp.mean((xf - mean) ** 2, axis=-1, keepdims=True)
    xn = (xf - mean) * jax.lax.rsqrt(var + LN_EPS)
    y = xn * ln_gamma + ln_beta
    return (y @ w_t + w_bias).astype(x.dtype)


if __name__ == "__main__":
    B, N, D = 2, 8, 128  # batch=2, seq=8, hidden dim=128 (lane-dense)

    key = jax.random.PRNGKey(0)
    kx, kg, kb, kw, kwb = jax.random.split(key, 5)

    x = jax.random.normal(kx, (B, N, D), dtype=jnp.float32)

    # LayerNorm params (PyTorch init: gamma=1, beta=0; perturbed slightly but
    # deterministically so the scale/shift paths are exercised).
    ln_gamma = jnp.ones((D,), jnp.float32) + 0.01 * jax.random.normal(kg, (D,))
    ln_beta = 0.01 * jax.random.normal(kb, (D,), dtype=jnp.float32)

    # fn = Linear(D, D): PyTorch stores W as (out, in); we pass W^T = (in, out).
    # The bf16 copy is made ONCE here (outside the jitted call).
    w = jax.random.normal(kw, (D, D), dtype=jnp.float32) * (1.0 / jnp.sqrt(D))
    w_t = w.T
    w_t_bf16 = w_t.astype(jnp.bfloat16)
    w_bias = 0.01 * jax.random.normal(kwb, (D,), dtype=jnp.float32)

    out = prenorm_linear(x, ln_gamma, ln_beta, w_t_bf16, w_bias)
    out = jax.block_until_ready(out)

    ref = _reference(x, ln_gamma, ln_beta, w_t, w_bias)
    assert out.shape == (B, N, D)
    # Tolerance loosened for bf16 matmul operands (f32 accumulation).
    assert jnp.allclose(out, ref, atol=2e-2, rtol=2e-2), "mismatch vs reference"

    print("KERNEL_OK")
</pallas_src>

<mosaic_0001>
module attributes {stable_mosaic.version = 11 : i64} {
  func.func @_prenorm_linear_kernel(%arg0: i32, %arg1: i32, %arg2: memref<8x128xf32, #tpu.memory_space<vmem>>, %arg3: memref<1x128xf32, #tpu.memory_space<vmem>>, %arg4: memref<1x128xf32, #tpu.memory_space<vmem>>, %arg5: memref<128x128xbf16, #tpu.memory_space<vmem>>, %arg6: memref<1x128xf32, #tpu.memory_space<vmem>>, %arg7: memref<8x128xf32, #tpu.memory_space<vmem>>, %arg8: memref<8x128xbf16, #tpu.memory_space<vmem>>) attributes {dimension_semantics = [#tpu.dimension_semantics<parallel>, #tpu.dimension_semantics<arbitrary>], iteration_bounds = array<i64: 2, 1>, scalar_prefetch = 0 : i64, scratch_operands = 1 : i64, tpu.core_type = #tpu.core_type<tc>, window_params = [{transform_indices = @transform_0, window_bounds = array<i64: 8, 128>}, {pipeline_mode = #tpu.pipeline_mode<synchronous>, transform_indices = @transform_1, window_bounds = array<i64: 1, 128>}, {pipeline_mode = #tpu.pipeline_mode<synchronous>, transform_indices = @transform_2, window_bounds = array<i64: 1, 128>}, {pipeline_mode = #tpu.pipeline_mode<synchronous>, transform_indices = @transform_3, window_bounds = array<i64: 128, 128>}, {pipeline_mode = #tpu.pipeline_mode<synchronous>, transform_indices = @transform_4, window_bounds = array<i64: 1, 128>}, {transform_indices = @transform_5, window_bounds = array<i64: 8, 128>}]} {
    %c0_i32 = arith.constant 0 : i32
    %0 = arith.cmpi eq, %arg1, %c0_i32 : i32
    %1 = arith.extui %0 : i1 to i32
    %c0_i32_0 = arith.constant 0 : i32
    %2 = arith.cmpi ne, %1, %c0_i32_0 : i32
    scf.if %2 {
      %c0_8 = arith.constant 0 : index
      %c0_9 = arith.constant 0 : index
      %10 = vector.load %arg2[%c0_8, %c0_9] : memref<8x128xf32, #tpu.memory_space<vmem>>, vector<8x128xf32>
      %cst_10 = arith.constant dense<0.000000e+00> : vector<8xf32>
      %11 = vector.multi_reduction <add>, %10, %cst_10 [1] : vector<8x128xf32> to vector<8xf32>
      %12 = vector.shape_cast %11 : vector<8xf32> to vector<8x1xf32>
      %cst_11 = arith.constant 1.280000e+02 : f32
      %13 = vector.broadcast %cst_11 : f32 to vector<8x1xf32>
      %14 = arith.divf %12, %13 : vector<8x1xf32>
      %15 = arith.mulf %10, %10 : vector<8x128xf32>
      %cst_12 = arith.constant dense<0.000000e+00> : vector<8xf32>
      %16 = vector.multi_reduction <add>, %15, %cst_12 [1] : vector<8x128xf32> to vector<8xf32>
      %17 = vector.shape_cast %16 : vector<8xf32> to vector<8x1xf32>
      %cst_13 = arith.constant 1.280000e+02 : f32
      %18 = vector.broadcast %cst_13 : f32 to vector<8x1xf32>
      %19 = arith.divf %17, %18 : vector<8x1xf32>
      %20 = arith.mulf %14, %14 : vector<8x1xf32>
      %21 = arith.subf %19, %20 : vector<8x1xf32>
      %cst_14 = arith.constant 9.99999974E-6 : f32
      %22 = vector.broadcast %cst_14 : f32 to vector<8x1xf32>
      %23 = arith.addf %21, %22 : vector<8x1xf32>
      %24 = math.rsqrt %23 : vector<8x1xf32>
      %c0_15 = arith.constant 0 : index
      %c0_16 = arith.constant 0 : index
      %25 = vector.load %arg3[%c0_15, %c0_16] : memref<1x128xf32, #tpu.memory_space<vmem>>, vector<1x128xf32>
      %26 = vector.broadcast %25 : vector<1x128xf32> to vector<8x128xf32>
      %27 = vector.broadcast %24 : vector<8x1xf32> to vector<8x128xf32>
      %28 = arith.mulf %26, %27 : vector<8x128xf32>
      %29 = vector.broadcast %14 : vector<8x1xf32> to vector<8x128xf32>
      %30 = arith.subf %10, %29 : vector<8x128xf32>
      %31 = arith.mulf %30, %28 : vector<8x128xf32>
      %c0_17 = arith.constant 0 : index
      %c0_18 = arith.constant 0 : index
      %32 = vector.load %arg4[%c0_17, %c0_18] : memref<1x128xf32, #tpu.memory_space<vmem>>, vector<1x128xf32>
      %33 = vector.broadcast %32 : vector<1x128xf32> to vector<8x128xf32>
      %34 = arith.addf %31, %33 : vector<8x128xf32>
      %35 = arith.truncf %34 : vector<8x128xf32> to vector<8x128xbf16>
      %c0_19 = arith.constant 0 : index
      %c0_20 = arith.constant 0 : index
      %36 = vector.load %arg8[%c0_19, %c0_20] : memref<8x128xbf16, #tpu.memory_space<vmem>>, vector<8x128xbf16>
      tpu.vector_store %arg8[%c0_19, %c0_20], %35 {strides = array<i32>} : memref<8x128xbf16, #tpu.memory_space<vmem>>, vector<8x128xbf16>,
    } else {
    }
    %c0 = arith.constant 0 : index
    %c0_1 = arith.constant 0 : index
    %3 = vector.load %arg8[%c0, %c0_1] : memref<8x128xbf16, #tpu.memory_space<vmem>>, vector<8x128xbf16>
    %c0_2 = arith.constant 0 : index
    %c0_3 = arith.constant 0 : index
    %4 = vector.load %arg5[%c0_2, %c0_3] : memref<128x128xbf16, #tpu.memory_space<vmem>>, vector<128x128xbf16>
    %cst = arith.constant dense<0.000000e+00> : vector<8x128xf32>
    %5 = tpu.matmul %3, %4, %cst {dimension_numbers = #tpu.dot_dimension_numbers<[1], [0], [0], [1], [0, 0, 1, 1], [], []>} : vector<8x128xbf16>, vector<128x128xbf16>, vector<8x128xf32> -> vector<8x128xf32>
    %c0_4 = arith.constant 0 : index
    %c0_5 = arith.constant 0 : index
    %6 = vector.load %arg6[%c0_4, %c0_5] : memref<1x128xf32, #tpu.memory_space<vmem>>, vector<1x128xf32>
    %7 = vector.broadcast %6 : vector<1x128xf32> to vector<8x128xf32>
    %8 = arith.addf %5, %7 : vector<8x128xf32>
    %c0_6 = arith.constant 0 : index
    %c0_7 = arith.constant 0 : index
    %9 = vector.load %arg7[%c0_6, %c0_7] : memref<8x128xf32, #tpu.memory_space<vmem>>, vector<8x128xf32>
    tpu.vector_store %arg7[%c0_6, %c0_7], %8 {strides = array<i32>} : memref<8x128xf32, #tpu.memory_space<vmem>>, vector<8x128xf32>,
    return
  }
  func.func @transform_0(%arg0: i32, %arg1: i32) -> (i32, i32) {
    %c0_i32 = arith.constant 0 : i32
    %c0_i32_0 = arith.constant 0 : i32
    return %arg0, %c0_i32 : i32, i32
  }
  func.func @transform_1(%arg0: i32, %arg1: i32) -> (i32, i32) {
    %c0_i32 = arith.constant 0 : i32
    %c0_i32_0 = arith.constant 0 : i32
    %c0_i32_1 = arith.constant 0 : i32
    return %c0_i32, %c0_i32_0 : i32, i32
  }
  func.func @transform_2(%arg0: i32, %arg1: i32) -> (i32, i32) {
    %c0_i32 = arith.constant 0 : i32
    %c0_i32_0 = arith.constant 0 : i32
    %c0_i32_1 = arith.constant 0 : i32
    return %c0_i32, %c0_i32_0 : i32, i32
  }
  func.func @transform_3(%arg0: i32, %arg1: i32) -> (i32, i32) {
    %c0_i32 = arith.constant 0 : i32
    %c0_i32_0 = arith.constant 0 : i32
    return %c0_i32, %arg1 : i32, i32
  }
  func.func @transform_4(%arg0: i32, %arg1: i32) -> (i32, i32) {
    %c0_i32 = arith.constant 0 : i32
    %c0_i32_0 = arith.constant 0 : i32
    return %c0_i32, %arg1 : i32, i32
  }
  func.func @transform_5(%arg0: i32, %arg1: i32) -> (i32, i32) {
    %c0_i32 = arith.constant 0 : i32
    return %arg0, %arg1 : i32, i32
  }
}

</mosaic_0001>

<bundles_post_ra>
// kernel: prenorm_linear.1
= control target key start
LH: loop header
LB: loop body
LE: loop exit
PB: predicated region body
PF: predicated region fallthrough
CT: control target
= control target key end

     0   :  { %10 = vsyncpa [#allocation4], 0  ;;  %s1020_s0 = inlined_call_operand.hbm [shape: f32[16,128], index: 0, kind: input, shape index: {}]   ;;  %s1021_s1 = inlined_call_operand.vmem [shape: f32[1,128], index: 1, kind: input, shape index: {}]   ;;  %s1022_s2 = inlined_call_operand.vmem [shape: f32[1,128], index: 2, kind: input, shape index: {}]   ;;  %s1023_s3 = inlined_call_operand.hbm [shape: bf16[128,128], index: 3, kind: input, shape index: {}]   ;;  %s1024_s4 = inlined_call_operand.vmem [shape: f32[1,128], index: 4, kind: input, shape index: {}]   ;;  %s1025_s5 = inlined_call_operand.hbm [shape: f32[16,128], index: 5, kind: output, shape index: {}]  }
   0x1   :  { %12 = vsyncpa [#allocation4 + $0x1], 0 }
   0x2   :  { %13 = vsyncpa [#allocation7], 0 }
   0x3   :  { %14 = vsyncpa [#allocation5], 0 }
   0x4   :  { %16 = vsyncpa [#allocation5 + $0x1], 0  ;;  %s864_s18 = smov 0   ;;  %s866_s19 = smov 0  }
   0x5   :  { %s868_s20 = smov 0   ;;  %s870_s21 = smov 0  }
   0x6   :  { %s872_s22 = smov 0   ;;  %s874_s23 = smov 0  }
   0x7 LB: > { %s543_s24 = sadd.s32 4294967295, %s828_s23   ;;  %p545_p0 = scmp.ge.s32.totalorder %s828_s23, 1  ;;  %s828_s23 = sphi %s874_s23, %s22_s23   ;;  %s824_s22 = sphi %s872_s22, %s1036_s22   ;;  %s820_s21 = sphi %s870_s21, %s1035_s21   ;;  %s816_s20 = sphi %s868_s20, %s1034_s20   ;;  %s812_s19 = sphi %s866_s19, %s1033_s19   ;;  %s808_s18 = sphi %s864_s18, %s1032_s18  }
   0x8   : > { %p896_p1 = scmp.eq.s32.totalorder %s543_s24, 0  ;;  %p187_p2 = scmp.lt.s32.totalorder %s828_s23, 3 }
   0x9   : > { %s206_s28 = sshll.u32 %s1023_s3, 4  ;;  %s830_s30 = smov [#allocation6]   ;;  %s207_s28 = int_to_ptr.hbm [resolvable:$true] %s206_s28 }
   0xa   : > { %p904_p3 = pnand %p545_p0, %p187_p2  ;;  %s208_s6 = sshll.u32 %s830_s30, 4  ;;  %s209_s6 = int_to_ptr.vmem [resolvable:$true] %s208_s6 }
   0xb   : > { %p548_p6 = scmp.ge.s32.totalorder %s828_s23, 2  ;;  %s831_s7 = smov 64  }
   0xc   : > { %p607_p4 = pneg %p904_p3  ;;  %s832_s8 = smov 4  }
   0xd   : > { %s544_s9 = sadd.s32 4294967294, %s828_s23   ;;  %s34_s10 = sadd.s32 1, %s824_s22 }
   0xe   : > { %p608_p5 = pnand %p607_p4, %p896_p1  ;;  %s41_s11 = sadd.s32 1, %s816_s20 }
   0xf   : > { %p36_p7 = scmp.ge.s32.totalorder %s34_s10, 2  ;;  %p48_p8 = scmp.ne.s32.totalorder %s816_s20, %s812_s19 }
  0x10   : > { %610 = dma.hbm_to_vmem [thread:$0]  (!%p608_p5), %s207_s28, 1024, %s209_s6, [#allocation7], %s831_s7, %s831_s7, %s832_s8  }
  0x11   : > { %p49_p9 = scmp.eq.s32.totalorder %s828_s23, 0  ;;  %p54_p10 = scmp.ne.s32.totalorder %s812_s19, %s808_s18 }
  0x12   : > { %s1038_s10 = smov (%p36_p7, %s34_s10), 0  ;;  %p174_p13 = scmp.eq.s32.totalorder %s543_s24, 1 }
  0x13   : > { %p923_p11 = por %p49_p9, %p48_p8  ;;  %p929_p12 = por %p896_p1, %p54_p10 }
  0x14   : > { %s38_s14 = ssub.s32 %s824_s22, %s1038_s10  ;;  %p180_p2 = scmp.eq.s32.totalorder %s544_s9, 1 }
  0x15   : > { %p39_p0 = scmp.eq.s32.totalorder %s38_s14, 0  ;;  %p935_p4 = por %p174_p13, %p48_p8 }
  0x16   : > { %p620_p5 = scmp.lt.s32.totalorder %s828_s23, 2  ;;  %p943_p7 = por %p180_p2, %p54_p10 }
  0x17   : > { %s941_s16 = scalar_select %p39_p0, %s816_s20, %s41_s11  }
  0x18   : > { %s228_s26 = sand.u32 1, %s816_s20   ;;  %s550_s28 = sshll.u32 %s824_s22, 3 }
  0x19   : > { %s549_s27 = sshll.u32 %s228_s26, 3  ;;  %s236_s24 = scalar_lea.hbm %s1020_s0, %s550_s28 }
  0x1a   : > { %s232_s7 = scalar_lea.vmem [#allocation3], %s549_s27  ;;  %s238_s9 = sshll.u32 %s236_s24, 4  ;;  %s239_s9 = int_to_ptr.hbm [resolvable:$true] %s238_s9 }
  0x1b   : > { %s240_s8 = sshll.u32 %s232_s7, 4  ;;  %p612_p8 = pnand %p620_p5, %p923_p11  ;;  %s241_s8 = int_to_ptr.vmem [resolvable:$true] %s240_s8 }
  0x1c   : > { %s229_s11 = scalar_lea.sflag [#allocation4], %s228_s26  ;;  %249 = sbr.rel (%p904_p3) target bundleno = 335 (0x14f), region = 40 }
  0x1d   : > { %614 = dma.hbm_to_vmem [thread:$0]  (!%p612_p8), %s239_s9, 128, %s241_s8, %s229_s11  }
  0x1e   : > { %s957_s14 = sand.u32 (!%p904_p3), 1, %s812_s19  }
  0x1f   : > { %s552_s28 = sshll.u32 (!%p904_p3), %s957_s14, 3  ;;  %s252_s27 = scalar_lea.sflag (!%p904_p3), [#allocation4], %s957_s14 }
  0x20   : > { %s255_s30 = scalar_lea.vmem (!%p904_p3), [#allocation3], %s552_s28 }
  0x21   : > { %795 = dma.done.wait (%p929_p12), %s252_s27, 128  }
  0x22   : > { %797 = vsyncadd (%p929_p12), %s252_s27, 4294967168 }
  0x23   : > { %799 = dma.done.wait (%p896_p1), [#allocation7], 1024  }
  0x24   : > { %801 = vsyncadd (%p896_p1), [#allocation7], 4294966272  ;;  %v298_v0 = vld [vmem:[%s255_s30] sm:$0xff]  ;;  %v833_v2 = vmov 128.0   ;;  %v596_v8 = vld [vmem:[#allocation6 + $0x28] sm:$0xff]  ;;  %s588_s26 = sshll.u32 %s820_s21, 3 }
  0x25   : > { %299 = vadd.xlane.f32.xlu0 %v298_v0  ;;  %v309_v1 = vmul.f32 %v298_v0, %v298_v0  ;;  %678 = vrcp.f32 %v833_v2  ;;  %v598_v4 = vld [vmem:[#allocation6 + $0x38] sm:$0xff]  ;;  %v597_v6 = vld [vmem:[#allocation6 + $0x30] sm:$0xff]  ;;  %v595_v10 = vld [vmem:[#allocation6 + $0x20] sm:$0xff]  ;;  %s435_s7 = scalar_lea.hbm %s1025_s5, %s588_s26  ;;  %s290_s11 = scalar_lea.vmem [#allocation8], %s552_s28 }
  0x26   : > { %409 = vmatpush.bf16.msra.mxu0 %v598_v4  ;;  %v594_v13 = vld [vmem:[#allocation6 + $0x18] sm:$0xff]  ;;  %v593_v15 = vld [vmem:[#allocation6 + $0x10] sm:$0xff]  ;;  %v592_v18 = vld [vmem:[#allocation6 + $0x8] sm:$0xff]  ;;  %s437_s27 = sshll.u32 %s290_s11, 4  ;;  %s439_s30 = sshll.u32 %s435_s7, 4  ;;  %s438_s27 = int_to_ptr.vmem [resolvable:$true] %s437_s27  ;;  %s440_s30 = int_to_ptr.hbm [resolvable:$true] %s439_s30 }
  0x27   : > { %v591_v21 = vld [vmem:[#allocation6] sm:$0xff]  ;;  %v675_v29 = vld [vmem:[%s1021_s1] ss:$0 sm:$0xff]  ;;  %s424_s25 = scalar_lea.sflag [#allocation5], %s957_s14  ;;  %s756_s21 = sshra.s32 %s440_s30, 4  ;;  %s757_s21 = int_to_ptr.hbm [resolvable:$true] %s756_s21 }
  0x28   : > { %v676_v33 = vld [vmem:[%s1022_s2] ss:$0 sm:$0xff]  ;;  %s758_s29 = scalar_lea.hbm %s757_s21, 8  ;;  %s762_s26 = scalar_lea.hbm %s1025_s5, 16 }
  0x29   : > { %v677_v39 = vld [vmem:[%s1024_s4] ss:$0 sm:$0xff]  ;;  %p759_p1 = scmp.ne.s32.totalorder %s757_s21, %s758_s29  ;;  %p763_p10 = scmp.lt.s32.totalorder %s757_s21, %s1025_s5 }
  0x2a   : > { %410 = vmatpush.bf16.msra.mxu0 %v597_v6  ;;  %p764_p11 = scmp.lt.s32.totalorder %s762_s26, %s758_s29 }
  0x2b   : > { %v679_v3 = vpop.eup %678  ;;  %p760_p3 = pnand %p759_p1, %p935_p4 }
  0x2c   : > { %v302_v5 = vmul.f32 128.0, %v679_v3  ;;  %vm306_vm0 = vweird.f32 %v679_v3  ;;  %p765_p12 = por %p764_p11, %p763_p10 }
  0x2d   : > { %310 = vadd.xlane.f32.xlu0 %v309_v1  ;;  %p761_p9 = pneg %p760_p3 }
  0x2e   : > { %v303_v7 = vsub.f32 1.0, %v302_v5  ;;  %411 = vmatpush.bf16.msra.mxu0 %v596_v8 }
  0x2f   : > { %p766_p13 = pnand %p765_p12, %p761_p9 }
  0x30   : > { %v304_v9 = vmul.f32 %v679_v3, %v303_v7 }
  0x32   : > { %v305_v11 = vadd.f32 %v679_v3, %v304_v9  ;;  %412 = vmatpush.bf16.msra.mxu0 %v595_v10 }
  0x34   : > { %v307_v14 = vsel %vm306_vm0, %v679_v3, %v305_v11 }
  0x36   : > { %413 = vmatpush.bf16.msra.mxu0 %v594_v13 }
  0x3a   : > { %414 = vmatpush.bf16.msra.mxu0 %v593_v15 }
  0x3e   : > { %415 = vmatpush.bf16.msra.mxu0 %v592_v18 }
  0x42   : > { %416 = vmatpush.bf16.msra.mxu0 %v591_v21 }
  0x98   : > { %v300_v12 = vpop.xlane.xlu0 %299 }
  0x99   : > { %v308_v16 = vmul.f32 %v307_v14, %v300_v12 }
  0x9b   : > { %v313_v19 = vmul.f32 %v308_v16, %v308_v16  ;;  %v331_v32 = vsub.f32 %v298_v0, %v308_v16 }
  0xa0   : > { %v311_v17 = vpop.xlane.xlu0 %310 }
  0xa1   : > { %v312_v20 = vmul.f32 %v311_v17, %v307_v14 }
  0xa3   : > { %v314_v22 = vsub.f32 %v312_v20, %v313_v19 }
  0xa5   : > { %v315_v23 = vadd.f32 1e-05, %v314_v22 }
  0xa7   : > { %680 = vrsqrt.f32 %v315_v23  ;;  %vm322_vm2 = vweird.f32 %v315_v23 }
  0xad   : > { %v681_v24 = vpop.eup %680 }
  0xae   : > { %v317_v25 = vmul.f32 %v681_v24, %v315_v23  ;;  %vm323_vm1 = vweird.f32 %v681_v24 }
  0xaf   : > { %vm324_vm3 = vmor %vm322_vm2, %vm323_vm1 }
  0xb0   : > { %v318_v26 = vmul.f32 %v681_v24, %v317_v25 }
  0xb2   : > { %v319_v27 = vmul.f32 0.5, %v318_v26 }
  0xb4   : > { %v320_v28 = vsub.f32 1.5, %v319_v27 }
  0xb6   : > { %v321_v30 = vmul.f32 %v681_v24, %v320_v28 }
  0xb8   : > { %v325_v31 = vsel %vm324_vm3, %v681_v24, %v321_v30 }
  0xb9   : > { %v330_v34 = vmul.f32 %v675_v29, %v325_v31 }
  0xbb   : > { %v332_v35 = vmul.f32 %v331_v32, %v330_v34 }
  0xbd   : > { %v337_v36 = vadd.f32 %v676_v33, %v332_v35 }
  0xbf   : > { %v338_v37 = vpack.c.bf16 %v337_v36, %v337_v36 }
  0xc1   : > { %339 = vst [vmem:[#allocation2] sm:$0xf] %v338_v37 }
  0xc8   : > { %v340_v38 = vld [vmem:[#allocation2] sm:$0xf] }
  0xc9   : > { %417 = vmatmul.bf16.vlgmr.msra.gmra.mxu0 %v340_v38 }
 0x146   : > { %v418_v40 = vpop.f32.mrf.mxu0 }
 0x147   : > { %v419_v41 = vadd.f32 %v677_v39, %v418_v40 }
 0x149   : > { %422 = vst [vmem:[%s290_s11] sm:$0xff] %v419_v41 }
 0x14a   : > { %769 = shalt.err (!%p766_p13)
}
 0x14b   : > { %605 = dma.vmem_to_hbm [thread:$0]  (%p935_p4), %s438_s27, 128, %s440_s30, %s424_s25  }
 0x14e   : > { %v420_v42 = vpop.f32.mrf.mxu0 }
 0x14f PF: > { %s451_s14 = sand.u32 1, %s808_s18   ;;  %p616_p0 = pnand %p548_p6, %p943_p7 }
 0x150   : > { %s452_s24 = scalar_lea.sflag [#allocation5], %s451_s14 }
 0x151   : > { %p617_p2 = pneg %p616_p0 }
 0x153   : > { %803 = dma.done.wait (%p617_p2), %s452_s24, 128  }
 0x154   : > { %805 = vsyncadd (%p617_p2), %s452_s24, 4294967168  ;;  %s22_s23 = sadd.s32 1, %s828_s23   ;;  %s1032_s18 = smov %s812_s19 }
 0x155   : > { %p19_p5 = scmp.ge.s32.totalorder %s22_s23, 4   ;;  %s1033_s19 = smov %s816_s20 }
 0x156   : > { %s1034_s20 = smov %s941_s16  ;;  %s1035_s21 = smov %s824_s22 }
 0x157   : > { %s1036_s22 = smov %s1038_s10  ;;  %21 = sbr.rel (!%p19_p5) target bundleno = 7 (0x7), region = 97 }
 0x15c   :  { %458 = vsyncpa [#allocation4], 1 }
 0x15d   :  { %460 = vsyncpa [#allocation4 + $0x1], 1 }
 0x15e   :  { %461 = vsyncpa [#allocation7], 1 }
 0x15f   :  { %462 = vsyncpa [#allocation5], 1 }
 0x160   :  { %464 = vsyncpa [#allocation5 + $0x1], 1 }

</bundles_post_ra>
